<compile_context>
chip_gen: v6e
topology: v6e:2x2x1
jax: 0.10.0
libtpu: 0.0.40
codegen_flags: <defaults>
</compile_context>

<pallas_src>
import jax
import jax.numpy as jnp
import numpy as np
from jax.experimental import pallas as pl
from jax.experimental.pallas import tpu as pltpu

OUT_PAD = 128  # lane-dense padding of the 1-wide output head


# ---------------------------------------------------------------------------
# Parameter-slab layout helpers (static, computed once in Python)
# ---------------------------------------------------------------------------
def _round_up(n, m):
    return ((n + m - 1) // m) * m


def _build_layout(entries):
    """entries: list of (name, (rows, cols)).  Each param starts on an 8-row
    boundary inside the slab; returns (layout, total_rows)."""
    layout, row = {}, 0
    for name, (r, c) in entries:
        layout[name] = (row, r, c)
        row += _round_up(r, 8)
    return layout, row


def _pack_slab(arrays, entries, layout, total_rows, width):
    slab = jnp.zeros((total_rows, width), jnp.float32)
    for name, (r, c) in entries:
        r0 = layout[name][0]
        slab = slab.at[r0:r0 + r, :c].set(arrays[name])
    return slab


# ---------------------------------------------------------------------------
# Factory: builds the fused kernel, the jitted forward, and the param packer
# ---------------------------------------------------------------------------
def make_example_net(num_node_features, num_edge_features):
    fn, fe = num_node_features, num_edge_features
    fout1, fin2, fout2 = 32, 32, 16

    # Slab 1: all "narrow" parameters, padded to a 128-lane-wide f32 slab.
    slab1_entries = [
        ("c1_w1",   (fe, 32)),
        ("c1_b1",   (1, 32)),
        ("c1_w2",   (32, fn * fout1)),
        ("c1_b2",   (1, fn * fout1)),
        ("c1_root", (fn, fout1)),
        ("c1_bias", (1, fout1)),
        ("c2_w1",   (fe, 32)),
        ("c2_b1",   (1, 32)),
        ("c2_root", (fin2, fout2)),
        ("c2_bias", (1, fout2)),
        ("fc1_w",   (fout2, 32)),
        ("fc1_b",   (1, 32)),
        ("out_w",   (32, 1)),    # zero lanes 1..127 give the padded head for free
        ("out_b",   (1, 1)),
    ]
    # Slab 2: the wide conv2 edge-MLP output layer + bias + the 0/1 repeat
    # matrix that broadcasts h_src across the flat [fin2*fout2] lanes on the MXU.
    slab2_entries = [
        ("c2_w2", (32, fin2 * fout2)),
        ("c2_b2", (1, fin2 * fout2)),
        ("rep2",  (fin2, fin2 * fout2)),
    ]
    lay1, rows1 = _build_layout(slab1_entries)
    lay2, rows2 = _build_layout(slab2_entries)
    width1 = _round_up(max(max(c for _, (_, c) in slab1_entries), OUT_PAD), 128)
    width2 = _round_up(max(c for _, (_, c) in slab2_entries), 128)

    # rep2[f, f*fout2 + o] = 1  (exact 0/1; built once).
    rep_const = np.zeros((fin2, fin2 * fout2), np.float32)
    rep_const[np.arange(fin2)[:, None],
              np.arange(fin2)[:, None] * fout2 + np.arange(fout2)[None, :]] = 1.0

    # -------------------------- the fused kernel ---------------------------
    def kernel(x_ref, ea_ref, gath_ref, scat_ref, pool_ref, p1_ref, p2_ref, o_ref):
        f32 = jnp.float32

        def p1(name, ncols=None):
            r0, r, c = lay1[name]
            return p1_ref[r0:r0 + r, 0:(c if ncols is None else ncols)]

        def p2(name):
            r0, r, c = lay2[name]
            return p2_ref[r0:r0 + r, 0:c]

        x0 = x_ref[...]        # [N, fn]   f32 node features
        ea = ea_ref[...]       # [E, fe]   f32 edge features
        gath = gath_ref[...]   # [E, N]    f32 one-hot gather of src nodes
        scat = scat_ref[...]   # [N, E]    f32 one-hot scatter-add onto dst nodes
        pool = pool_ref[...]   # [B, N]    f32 one-hot global_add_pool

        def edge_mlp(w1, b1, w2, b2):
            # Sequential(Linear(fe, 32), ReLU, Linear(32, fin*fout)) over all edges.
            h = jnp.maximum(jnp.dot(ea, w1, preferred_element_type=f32) + b1, 0.0)
            return jnp.dot(h, w2, preferred_element_type=f32) + b2

        # ------------------ conv1: NNConv(fn -> 32) + ReLU -----------------
        ew1 = edge_mlp(p1("c1_w1"), p1("c1_b1"), p1("c1_w2"), p1("c1_b2"))   # [E, fn*32]
        hs1 = jnp.dot(gath, x0, preferred_element_type=f32)                  # [E, fn]
        # fn=4 slices of a 128-lane-aligned buffer: keep the tiny unroll.
        msg1 = hs1[:, 0:1] * ew1[:, 0:fout1]
        for f in range(1, fn):
            msg1 = msg1 + hs1[:, f:f + 1] * ew1[:, f * fout1:(f + 1) * fout1]
        agg1 = jnp.dot(scat, msg1, preferred_element_type=f32)               # [N, 32]
        x1 = jnp.maximum(
            jnp.dot(x0, p1("c1_root"), preferred_element_type=f32) + agg1 + p1("c1_bias"),
            0.0)

        # ------------------ conv2: NNConv(32 -> 16) + ReLU -----------------
        ew2 = edge_mlp(p1("c2_w1"), p1("c2_b1"), p2("c2_w2"), p2("c2_b2"))   # [E, 512]
        hs2 = jnp.dot(gath, x1, preferred_element_type=f32)                  # [E, 32]
        # Broadcast hs2 across the flat [fin*fout] lanes via an MXU matmul with a
        # 0/1 repeat matrix, multiply once, then fold halves (5 adds) to realise
        # msg2[e, o] = sum_f hs2[e, f] * ew2[e, f*fout + o] without a 32-step
        # serial chain or unaligned 16-lane slices.
        wide = jnp.dot(hs2, p2("rep2"), preferred_element_type=f32) * ew2    # [E, 512]
        half = fin2 * fout2
        s = wide
        while half > fout2:
            half //= 2
            s = s[:, 0:half] + s[:, half:2 * half]
        msg2 = s                                                             # [E, 16]
        agg2 = jnp.dot(scat, msg2, preferred_element_type=f32)               # [N, 16]
        x2 = jnp.maximum(
            jnp.dot(x1, p1("c2_root"), preferred_element_type=f32) + agg2 + p1("c2_bias"),
            0.0)

        # -------- global_add_pool -> relu(fc1) -> out (128-lane padded) -----
        pooled = jnp.dot(pool, x2, preferred_element_type=f32)               # [B, 16]
        h = jnp.maximum(
            jnp.dot(pooled, p1("fc1_w"), preferred_element_type=f32) + p1("fc1_b"),
            0.0)                                                             # [B, 32]
        o_ref[...] = (jnp.dot(h, p1("out_w", ncols=OUT_PAD), preferred_element_type=f32)
                      + p1("out_b", ncols=OUT_PAD))                          # [B, 128]

    # --------------------------- jitted forward ----------------------------
    @jax.jit
    def forward(x, edge_attr, gath, scat, pool, p1_slab, p2_slab):
        num_graphs = pool.shape[0]
        vmem = pl.BlockSpec(memory_space=pltpu.MemorySpace.VMEM)
        out_padded = pl.pallas_call(
            kernel,
            out_shape=jax.ShapeDtypeStruct((num_graphs, OUT_PAD), jnp.float32),
            in_specs=[vmem] * 7,      # whole arrays, single-buffered, no grid
            out_specs=vmem,
        )(x, edge_attr, gath, scat, pool, p1_slab, p2_slab)
        return out_padded[:, :1]

    # ------------------------- one-time param packer -----------------------
    def pack_params(params):
        arrs = dict(params)
        arrs["rep2"] = jnp.asarray(rep_const)
        s1 = _pack_slab(arrs, slab1_entries, lay1, rows1, width1)
        s2 = _pack_slab(arrs, slab2_entries, lay2, rows2, width2)
        return s1, s2

    return forward, pack_params


# ---------------------------------------------------------------------------
# One-time graph-operand prep (static graph -> hoisted out of the call path)
# ---------------------------------------------------------------------------
def prepare_graph_operands(edge_index, batch, num_nodes, num_graphs):
    src, dst = edge_index[0], edge_index[1]
    # f32 one-hots: values are exactly 0/1 and all in-kernel dots stay pure
    # f32 x f32 (no implicit bf16->f32 convert at the MXU).
    gath = jax.nn.one_hot(src, num_nodes, dtype=jnp.float32)              # [E, N]
    scat = jax.nn.one_hot(dst, num_nodes, dtype=jnp.float32).T            # [N, E]
    pool = jax.nn.one_hot(batch, num_graphs, dtype=jnp.float32).T         # [B, N]
    return gath, scat, pool


# ---------------------------------------------------------------------------
# Parameters (deterministic, PyTorch-Linear-style uniform init)
# ---------------------------------------------------------------------------
def init_linear(key, fan_in, fan_out):
    kw, kb = jax.random.split(key)
    bound = 1.0 / np.sqrt(fan_in)
    w = jax.random.uniform(kw, (fan_in, fan_out), jnp.float32, -bound, bound)
    b = jax.random.uniform(kb, (1, fan_out), jnp.float32, -bound, bound)
    return w, b


def init_params(key, num_node_features, num_edge_features):
    ks = jax.random.split(key, 8)
    p = {}
    # conv1: NNConv(Fn, 32, Seq(Linear(Fe,32), ReLU, Linear(32, 32*Fn)))
    p["c1_w1"], p["c1_b1"] = init_linear(ks[0], num_edge_features, 32)
    p["c1_w2"], p["c1_b2"] = init_linear(ks[1], 32, num_node_features * 32)
    p["c1_root"], p["c1_bias"] = init_linear(ks[2], num_node_features, 32)
    # conv2: NNConv(32, 16, Seq(Linear(Fe,32), ReLU, Linear(32, 32*16)))
    p["c2_w1"], p["c2_b1"] = init_linear(ks[3], num_edge_features, 32)
    p["c2_w2"], p["c2_b2"] = init_linear(ks[4], 32, 32 * 16)
    p["c2_root"], p["c2_bias"] = init_linear(ks[5], 32, 16)
    # heads
    p["fc1_w"], p["fc1_b"] = init_linear(ks[6], 16, 32)
    p["out_w"], p["out_b"] = init_linear(ks[7], 32, 1)
    return p


# ---------------------------------------------------------------------------
# Pure-JAX reference for a correctness sanity check
# ---------------------------------------------------------------------------
def ref_forward(params, x, edge_index, edge_attr, batch, num_graphs,
                num_node_features):
    p = params
    src, dst = edge_index[0], edge_index[1]

    def edge_mlp(e, w1, b1, w2, b2):
        return jnp.maximum(e @ w1 + b1, 0.0) @ w2 + b2

    def nnconv(h, ew_flat, root, bias, fin, fout):
        w = ew_flat.reshape(-1, fin, fout)
        msg = jnp.einsum("ef,efo->eo", h[src], w)
        agg = jax.ops.segment_sum(msg, dst, num_segments=h.shape[0])
        return jnp.maximum(h @ root + agg + bias, 0.0)

    e1 = edge_mlp(edge_attr, p["c1_w1"], p["c1_b1"], p["c1_w2"], p["c1_b2"])
    x1 = nnconv(x, e1, p["c1_root"], p["c1_bias"], num_node_features, 32)
    e2 = edge_mlp(edge_attr, p["c2_w1"], p["c2_b1"], p["c2_w2"], p["c2_b2"])
    x2 = nnconv(x1, e2, p["c2_root"], p["c2_bias"], 32, 16)
    pooled = jax.ops.segment_sum(x2, batch, num_segments=num_graphs)
    h = jnp.maximum(pooled @ p["fc1_w"] + p["fc1_b"], 0.0)
    return h @ p["out_w"] + p["out_b"]


# ---------------------------------------------------------------------------
if __name__ == "__main__":
    num_node_features = 4
    num_edge_features = 6
    N, E, B = 12, 24, 2

    key = jax.random.PRNGKey(0)
    kx, ke, k1, k2, k3, k4, kp = jax.random.split(key, 7)

    x = jax.random.normal(kx, (N, num_node_features), jnp.float32)
    edge_attr = jax.random.normal(ke, (E, num_edge_features), jnp.float32)
    # 12 edges inside graph 0 (nodes 0..5), 12 inside graph 1 (nodes 6..11)
    src = jnp.concatenate([jax.random.randint(k1, (E // 2,), 0, 6),
                           jax.random.randint(k2, (E // 2,), 6, 12)]).astype(jnp.int32)
    dst = jnp.concatenate([jax.random.randint(k3, (E // 2,), 0, 6),
                           jax.random.randint(k4, (E // 2,), 6, 12)]).astype(jnp.int32)
    edge_index = jnp.stack([src, dst])                                       # [2, E]
    batch = jnp.concatenate([jnp.zeros(6, jnp.int32), jnp.ones(6, jnp.int32)])  # [N]

    params = init_params(kp, num_node_features, num_edge_features)

    # One-time prep (hoisted out of the per-call path): graph one-hots + packed
    # parameter slabs (including the 128-lane-padded output head).
    forward, pack_params = make_example_net(num_node_features, num_edge_features)
    gath, scat, pool = prepare_graph_operands(edge_index, batch, N, B)
    p1_slab, p2_slab = pack_params(params)

    out = forward(x, edge_attr, gath, scat, pool, p1_slab, p2_slab)
    out = jax.block_until_ready(out)

    ref = ref_forward(params, x, edge_index, edge_attr, batch, B,
                      num_node_features)
    np.testing.assert_allclose(np.asarray(out), np.asarray(ref),
                               rtol=1e-4, atol=1e-4)
    print("KERNEL_OK")
</pallas_src>

<mosaic_0001>
module attributes {stable_mosaic.version = 11 : i64} {
  func.func @kernel(%arg0: memref<12x4xf32, #tpu.memory_space<vmem>>, %arg1: memref<24x6xf32, #tpu.memory_space<vmem>>, %arg2: memref<24x12xf32, #tpu.memory_space<vmem>>, %arg3: memref<12x24xf32, #tpu.memory_space<vmem>>, %arg4: memref<2x12xf32, #tpu.memory_space<vmem>>, %arg5: memref<192x128xf32, #tpu.memory_space<vmem>>, %arg6: memref<72x512xf32, #tpu.memory_space<vmem>>, %arg7: memref<2x128xf32, #tpu.memory_space<vmem>>) attributes {dimension_semantics = [], scalar_prefetch = 0 : i64, scratch_operands = 0 : i64, tpu.core_type = #tpu.core_type<tc>} {
    %c0 = arith.constant 0 : index
    %c0_0 = arith.constant 0 : index
    %0 = vector.load %arg0[%c0, %c0_0] : memref<12x4xf32, #tpu.memory_space<vmem>>, vector<12x4xf32>
    %c0_1 = arith.constant 0 : index
    %c0_2 = arith.constant 0 : index
    %1 = vector.load %arg1[%c0_1, %c0_2] : memref<24x6xf32, #tpu.memory_space<vmem>>, vector<24x6xf32>
    %c0_3 = arith.constant 0 : index
    %c0_4 = arith.constant 0 : index
    %2 = vector.load %arg2[%c0_3, %c0_4] : memref<24x12xf32, #tpu.memory_space<vmem>>, vector<24x12xf32>
    %c0_5 = arith.constant 0 : index
    %c0_6 = arith.constant 0 : index
    %3 = vector.load %arg3[%c0_5, %c0_6] : memref<12x24xf32, #tpu.memory_space<vmem>>, vector<12x24xf32>
    %c0_7 = arith.constant 0 : index
    %c0_8 = arith.constant 0 : index
    %4 = vector.load %arg4[%c0_7, %c0_8] : memref<2x12xf32, #tpu.memory_space<vmem>>, vector<2x12xf32>
    %c0_9 = arith.constant 0 : index
    %c0_10 = arith.constant 0 : index
    %5 = vector.load %arg5[%c0_9, %c0_10] : memref<192x128xf32, #tpu.memory_space<vmem>>, vector<6x32xf32>
    %c8 = arith.constant 8 : index
    %c0_11 = arith.constant 0 : index
    %6 = vector.load %arg5[%c8, %c0_11] : memref<192x128xf32, #tpu.memory_space<vmem>>, vector<1x32xf32>
    %c16 = arith.constant 16 : index
    %c0_12 = arith.constant 0 : index
    %7 = vector.load %arg5[%c16, %c0_12] : memref<192x128xf32, #tpu.memory_space<vmem>>, vector<32x128xf32>
    %c48 = arith.constant 48 : index
    %c0_13 = arith.constant 0 : index
    %8 = vector.load %arg5[%c48, %c0_13] : memref<192x128xf32, #tpu.memory_space<vmem>>, vector<1x128xf32>
    %cst = arith.constant dense<0.000000e+00> : vector<24x32xf32>
    %9 = tpu.matmul %1, %5, %cst {dimension_numbers = #tpu.dot_dimension_numbers<[1], [0], [0], [1], [0, 0, 1, 1], [], []>} : vector<24x6xf32>, vector<6x32xf32>, vector<24x32xf32> -> vector<24x32xf32>
    %10 = vector.broadcast %6 : vector<1x32xf32> to vector<24x32xf32>
    %11 = arith.addf %9, %10 : vector<24x32xf32>
    %cst_14 = arith.constant 0.000000e+00 : f32
    %12 = vector.broadcast %cst_14 : f32 to vector<24x32xf32>
    %13 = arith.maximumf %11, %12 : vector<24x32xf32>
    %cst_15 = arith.constant dense<0.000000e+00> : vector<24x128xf32>
    %14 = tpu.matmul %13, %7, %cst_15 {dimension_numbers = #tpu.dot_dimension_numbers<[1], [0], [0], [1], [0, 0, 1, 1], [], []>} : vector<24x32xf32>, vector<32x128xf32>, vector<24x128xf32> -> vector<24x128xf32>
    %15 = vector.broadcast %8 : vector<1x128xf32> to vector<24x128xf32>
    %16 = arith.addf %14, %15 : vector<24x128xf32>
    %cst_16 = arith.constant dense<0.000000e+00> : vector<24x4xf32>
    %17 = tpu.matmul %2, %0, %cst_16 {dimension_numbers = #tpu.dot_dimension_numbers<[1], [0], [0], [1], [0, 0, 1, 1], [], []>} : vector<24x12xf32>, vector<12x4xf32>, vector<24x4xf32> -> vector<24x4xf32>
    %18 = vector.extract_strided_slice %17 {offsets = [0, 0], sizes = [24, 1], strides = [1, 1]} : vector<24x4xf32> to vector<24x1xf32>
    %19 = vector.extract_strided_slice %16 {offsets = [0, 0], sizes = [24, 32], strides = [1, 1]} : vector<24x128xf32> to vector<24x32xf32>
    %20 = vector.broadcast %18 : vector<24x1xf32> to vector<24x32xf32>
    %21 = arith.mulf %20, %19 : vector<24x32xf32>
    %22 = vector.extract_strided_slice %17 {offsets = [0, 1], sizes = [24, 1], strides = [1, 1]} : vector<24x4xf32> to vector<24x1xf32>
    %23 = vector.extract_strided_slice %16 {offsets = [0, 32], sizes = [24, 32], strides = [1, 1]} : vector<24x128xf32> to vector<24x32xf32>
    %24 = vector.broadcast %22 : vector<24x1xf32> to vector<24x32xf32>
    %25 = arith.mulf %24, %23 : vector<24x32xf32>
    %26 = arith.addf %21, %25 : vector<24x32xf32>
    %27 = vector.extract_strided_slice %17 {offsets = [0, 2], sizes = [24, 1], strides = [1, 1]} : vector<24x4xf32> to vector<24x1xf32>
    %28 = vector.extract_strided_slice %16 {offsets = [0, 64], sizes = [24, 32], strides = [1, 1]} : vector<24x128xf32> to vector<24x32xf32>
    %29 = vector.broadcast %27 : vector<24x1xf32> to vector<24x32xf32>
    %30 = arith.mulf %29, %28 : vector<24x32xf32>
    %31 = arith.addf %26, %30 : vector<24x32xf32>
    %32 = vector.extract_strided_slice %17 {offsets = [0, 3], sizes = [24, 1], strides = [1, 1]} : vector<24x4xf32> to vector<24x1xf32>
    %33 = vector.extract_strided_slice %16 {offsets = [0, 96], sizes = [24, 32], strides = [1, 1]} : vector<24x128xf32> to vector<24x32xf32>
    %34 = vector.broadcast %32 : vector<24x1xf32> to vector<24x32xf32>
    %35 = arith.mulf %34, %33 : vector<24x32xf32>
    %36 = arith.addf %31, %35 : vector<24x32xf32>
    %cst_17 = arith.constant dense<0.000000e+00> : vector<12x32xf32>
    %37 = tpu.matmul %3, %36, %cst_17 {dimension_numbers = #tpu.dot_dimension_numbers<[1], [0], [0], [1], [0, 0, 1, 1], [], []>} : vector<12x24xf32>, vector<24x32xf32>, vector<12x32xf32> -> vector<12x32xf32>
    %c56 = arith.constant 56 : index
    %c0_18 = arith.constant 0 : index
    %38 = vector.load %arg5[%c56, %c0_18] : memref<192x128xf32, #tpu.memory_space<vmem>>, vector<4x32xf32>
    %cst_19 = arith.constant dense<0.000000e+00> : vector<12x32xf32>
    %39 = tpu.matmul %0, %38, %cst_19 {dimension_numbers = #tpu.dot_dimension_numbers<[1], [0], [0], [1], [0, 0, 1, 1], [], []>} : vector<12x4xf32>, vector<4x32xf32>, vector<12x32xf32> -> vector<12x32xf32>
    %40 = arith.addf %39, %37 : vector<12x32xf32>
    %c64 = arith.constant 64 : index
    %c0_20 = arith.constant 0 : index
    %41 = vector.load %arg5[%c64, %c0_20] : memref<192x128xf32, #tpu.memory_space<vmem>>, vector<1x32xf32>
    %42 = vector.broadcast %41 : vector<1x32xf32> to vector<12x32xf32>
    %43 = arith.addf %40, %42 : vector<12x32xf32>
    %cst_21 = arith.constant 0.000000e+00 : f32
    %44 = vector.broadcast %cst_21 : f32 to vector<12x32xf32>
    %45 = arith.maximumf %43, %44 : vector<12x32xf32>
    %c72 = arith.constant 72 : index
    %c0_22 = arith.constant 0 : index
    %46 = vector.load %arg5[%c72, %c0_22] : memref<192x128xf32, #tpu.memory_space<vmem>>, vector<6x32xf32>
    %c80 = arith.constant 80 : index
    %c0_23 = arith.constant 0 : index
    %47 = vector.load %arg5[%c80, %c0_23] : memref<192x128xf32, #tpu.memory_space<vmem>>, vector<1x32xf32>
    %c0_24 = arith.constant 0 : index
    %c0_25 = arith.constant 0 : index
    %48 = vector.load %arg6[%c0_24, %c0_25] : memref<72x512xf32, #tpu.memory_space<vmem>>, vector<32x512xf32>
    %c32 = arith.constant 32 : index
    %c0_26 = arith.constant 0 : index
    %49 = vector.load %arg6[%c32, %c0_26] : memref<72x512xf32, #tpu.memory_space<vmem>>, vector<1x512xf32>
    %cst_27 = arith.constant dense<0.000000e+00> : vector<24x32xf32>
    %50 = tpu.matmul %1, %46, %cst_27 {dimension_numbers = #tpu.dot_dimension_numbers<[1], [0], [0], [1], [0, 0, 1, 1], [], []>} : vector<24x6xf32>, vector<6x32xf32>, vector<24x32xf32> -> vector<24x32xf32>
    %51 = vector.broadcast %47 : vector<1x32xf32> to vector<24x32xf32>
    %52 = arith.addf %50, %51 : vector<24x32xf32>
    %cst_28 = arith.constant 0.000000e+00 : f32
    %53 = vector.broadcast %cst_28 : f32 to vector<24x32xf32>
    %54 = arith.maximumf %52, %53 : vector<24x32xf32>
    %cst_29 = arith.constant dense<0.000000e+00> : vector<24x512xf32>
    %55 = tpu.matmul %54, %48, %cst_29 {dimension_numbers = #tpu.dot_dimension_numbers<[1], [0], [0], [1], [0, 0, 1, 1], [], []>} : vector<24x32xf32>, vector<32x512xf32>, vector<24x512xf32> -> vector<24x512xf32>
    %56 = vector.broadcast %49 : vector<1x512xf32> to vector<24x512xf32>
    %57 = arith.addf %55, %56 : vector<24x512xf32>
    %cst_30 = arith.constant dense<0.000000e+00> : vector<24x32xf32>
    %58 = tpu.matmul %2, %45, %cst_30 {dimension_numbers = #tpu.dot_dimension_numbers<[1], [0], [0], [1], [0, 0, 1, 1], [], []>} : vector<24x12xf32>, vector<12x32xf32>, vector<24x32xf32> -> vector<24x32xf32>
    %c40 = arith.constant 40 : index
    %c0_31 = arith.constant 0 : index
    %59 = vector.load %arg6[%c40, %c0_31] : memref<72x512xf32, #tpu.memory_space<vmem>>, vector<32x512xf32>
    %cst_32 = arith.constant dense<0.000000e+00> : vector<24x512xf32>
    %60 = tpu.matmul %58, %59, %cst_32 {dimension_numbers = #tpu.dot_dimension_numbers<[1], [0], [0], [1], [0, 0, 1, 1], [], []>} : vector<24x32xf32>, vector<32x512xf32>, vector<24x512xf32> -> vector<24x512xf32>
    %61 = arith.mulf %60, %57 : vector<24x512xf32>
    %62 = vector.extract_strided_slice %61 {offsets = [0, 0], sizes = [24, 256], strides = [1, 1]} : vector<24x512xf32> to vector<24x256xf32>
    %63 = vector.extract_strided_slice %61 {offsets = [0, 256], sizes = [24, 256], strides = [1, 1]} : vector<24x512xf32> to vector<24x256xf32>
    %64 = arith.addf %62, %63 : vector<24x256xf32>
    %65 = vector.extract_strided_slice %64 {offsets = [0, 0], sizes = [24, 128], strides = [1, 1]} : vector<24x256xf32> to vector<24x128xf32>
    %66 = vector.extract_strided_slice %64 {offsets = [0, 128], sizes = [24, 128], strides = [1, 1]} : vector<24x256xf32> to vector<24x128xf32>
    %67 = arith.addf %65, %66 : vector<24x128xf32>
    %68 = vector.extract_strided_slice %67 {offsets = [0, 0], sizes = [24, 64], strides = [1, 1]} : vector<24x128xf32> to vector<24x64xf32>
    %69 = vector.extract_strided_slice %67 {offsets = [0, 64], sizes = [24, 64], strides = [1, 1]} : vector<24x128xf32> to vector<24x64xf32>
    %70 = arith.addf %68, %69 : vector<24x64xf32>
    %71 = vector.extract_strided_slice %70 {offsets = [0, 0], sizes = [24, 32], strides = [1, 1]} : vector<24x64xf32> to vector<24x32xf32>
    %72 = vector.extract_strided_slice %70 {offsets = [0, 32], sizes = [24, 32], strides = [1, 1]} : vector<24x64xf32> to vector<24x32xf32>
    %73 = arith.addf %71, %72 : vector<24x32xf32>
    %74 = vector.extract_strided_slice %73 {offsets = [0, 0], sizes = [24, 16], strides = [1, 1]} : vector<24x32xf32> to vector<24x16xf32>
    %75 = vector.extract_strided_slice %73 {offsets = [0, 16], sizes = [24, 16], strides = [1, 1]} : vector<24x32xf32> to vector<24x16xf32>
    %76 = arith.addf %74, %75 : vector<24x16xf32>
    %cst_33 = arith.constant dense<0.000000e+00> : vector<12x16xf32>
    %77 = tpu.matmul %3, %76, %cst_33 {dimension_numbers = #tpu.dot_dimension_numbers<[1], [0], [0], [1], [0, 0, 1, 1], [], []>} : vector<12x24xf32>, vector<24x16xf32>, vector<12x16xf32> -> vector<12x16xf32>
    %c88 = arith.constant 88 : index
    %c0_34 = arith.constant 0 : index
    %78 = vector.load %arg5[%c88, %c0_34] : memref<192x128xf32, #tpu.memory_space<vmem>>, vector<32x16xf32>
    %cst_35 = arith.constant dense<0.000000e+00> : vector<12x16xf32>
    %79 = tpu.matmul %45, %78, %cst_35 {dimension_numbers = #tpu.dot_dimension_numbers<[1], [0], [0], [1], [0, 0, 1, 1], [], []>} : vector<12x32xf32>, vector<32x16xf32>, vector<12x16xf32> -> vector<12x16xf32>
    %80 = arith.addf %79, %77 : vector<12x16xf32>
    %c120 = arith.constant 120 : index
    %c0_36 = arith.constant 0 : index
    %81 = vector.load %arg5[%c120, %c0_36] : memref<192x128xf32, #tpu.memory_space<vmem>>, vector<1x16xf32>
    %82 = vector.broadcast %81 : vector<1x16xf32> to vector<12x16xf32>
    %83 = arith.addf %80, %82 : vector<12x16xf32>
    %cst_37 = arith.constant 0.000000e+00 : f32
    %84 = vector.broadcast %cst_37 : f32 to vector<12x16xf32>
    %85 = arith.maximumf %83, %84 : vector<12x16xf32>
    %cst_38 = arith.constant dense<0.000000e+00> : vector<2x16xf32>
    %86 = tpu.matmul %4, %85, %cst_38 {dimension_numbers = #tpu.dot_dimension_numbers<[1], [0], [0], [1], [0, 0, 1, 1], [], []>} : vector<2x12xf32>, vector<12x16xf32>, vector<2x16xf32> -> vector<2x16xf32>
    %c128 = arith.constant 128 : index
    %c0_39 = arith.constant 0 : index
    %87 = vector.load %arg5[%c128, %c0_39] : memref<192x128xf32, #tpu.memory_space<vmem>>, vector<16x32xf32>
    %cst_40 = arith.constant dense<0.000000e+00> : vector<2x32xf32>
    %88 = tpu.matmul %86, %87, %cst_40 {dimension_numbers = #tpu.dot_dimension_numbers<[1], [0], [0], [1], [0, 0, 1, 1], [], []>} : vector<2x16xf32>, vector<16x32xf32>, vector<2x32xf32> -> vector<2x32xf32>
    %c144 = arith.constant 144 : index
    %c0_41 = arith.constant 0 : index
    %89 = vector.load %arg5[%c144, %c0_41] : memref<192x128xf32, #tpu.memory_space<vmem>>, vector<1x32xf32>
    %90 = vector.broadcast %89 : vector<1x32xf32> to vector<2x32xf32>
    %91 = arith.addf %88, %90 : vector<2x32xf32>
    %cst_42 = arith.constant 0.000000e+00 : f32
    %92 = vector.broadcast %cst_42 : f32 to vector<2x32xf32>
    %93 = arith.maximumf %91, %92 : vector<2x32xf32>
    %c152 = arith.constant 152 : index
    %c0_43 = arith.constant 0 : index
    %94 = vector.load %arg5[%c152, %c0_43] : memref<192x128xf32, #tpu.memory_space<vmem>>, vector<32x128xf32>
    %cst_44 = arith.constant dense<0.000000e+00> : vector<2x128xf32>
    %95 = tpu.matmul %93, %94, %cst_44 {dimension_numbers = #tpu.dot_dimension_numbers<[1], [0], [0], [1], [0, 0, 1, 1], [], []>} : vector<2x32xf32>, vector<32x128xf32>, vector<2x128xf32> -> vector<2x128xf32>
    %c184 = arith.constant 184 : index
    %c0_45 = arith.constant 0 : index
    %96 = vector.load %arg5[%c184, %c0_45] : memref<192x128xf32, #tpu.memory_space<vmem>>, vector<1x128xf32>
    %97 = vector.broadcast %96 : vector<1x128xf32> to vector<2x128xf32>
    %98 = arith.addf %95, %97 : vector<2x128xf32>
    %c0_46 = arith.constant 0 : index
    %c0_47 = arith.constant 0 : index
    %99 = vector.load %arg7[%c0_46, %c0_47] : memref<2x128xf32, #tpu.memory_space<vmem>>, vector<2x128xf32>
    tpu.vector_store %arg7[%c0_46, %c0_47], %98 {strides = array<i32>} : memref<2x128xf32, #tpu.memory_space<vmem>>, vector<2x128xf32>,
    return
  }
}

</mosaic_0001>

<bundles_post_ra>
// kernel: forward.1
= control target key start
LH: loop header
LB: loop body
LE: loop exit
PB: predicated region body
PF: predicated region fallthrough
CT: control target
= control target key end

     0   :  { %12 = vsyncpa [#allocation3], 0  ;;  %s2300_s0 = inlined_call_operand.vmem [shape: f32[12,4], index: 0, kind: input, shape index: {}]   ;;  %s2301_s1 = inlined_call_operand.vmem [shape: f32[24,6], index: 1, kind: input, shape index: {}]   ;;  %s2302_s2 = inlined_call_operand.vmem [shape: f32[24,12], index: 2, kind: input, shape index: {}]   ;;  %s2303_s3 = inlined_call_operand.vmem [shape: f32[12,24], index: 3, kind: input, shape index: {}]   ;;  %s2304_s4 = inlined_call_operand.vmem [shape: f32[2,12], index: 4, kind: input, shape index: {}]   ;;  %s2305_s5 = inlined_call_operand.hbm [shape: f32[192,128], index: 5, kind: input, shape index: {}]   ;;  %s2306_s6 = inlined_call_operand.hbm [shape: f32[72,512], index: 6, kind: input, shape index: {}]   ;;  %s2307_s7 = inlined_call_operand.vmem [shape: f32[2,128], index: 7, kind: output, shape index: {}]  }
   0x1   :  { %13 = vsyncpa [#allocation5], 0  ;;  %s2013_s24 = smov [#allocation2]  }
   0x2   :  { %s29_s25 = sshll.u32 %s2013_s24, 4  ;;  %s30_s25 = int_to_ptr.vmem [resolvable:$true] %s29_s25 }
   0x3   :  { %s1977_s26 = scalar_lea.vmem %s30_s25, 3072  ;;  %p1982_p1 = scmp.lt.s32.totalorder %s30_s25, %s30_s25 }
   0x4   :  { %p1978_p0 = scmp.ne.s32.totalorder %s30_s25, %s1977_s26  ;;  %p1983_p2 = scmp.lt.s32.totalorder %s1977_s26, %s1977_s26 }
   0x6   :  { %p1984_p3 = por %p1983_p2, %p1982_p1 }
   0x8   :  { %p1985_p4 = pnand %p1984_p3, %p1978_p0 }
   0xa   :  { %1988 = shalt.err (!%p1985_p4)
}
   0xb   :  { %s2014_s27 = smov 128   ;;  %s2015_s28 = smov 8  }
   0xc   :  { %35 = dma.hbm_to_vmem [thread:$0]  %s2305_s5, 3072, %s30_s25, [#allocation3], %s2014_s27, %s2014_s27, %s2015_s28  }
   0xd   :  { %s2016_s8 = smov [#allocation4]  }
   0xe   :  { %s41_s9 = sshll.u32 %s2016_s8, 4  ;;  %s42_s9 = int_to_ptr.vmem [resolvable:$true] %s41_s9 }
   0xf   :  { %s1997_s10 = scalar_lea.vmem %s42_s9, 4608  ;;  %p2002_p6 = scmp.lt.s32.totalorder %s42_s9, %s42_s9 }
  0x10   :  { %p1998_p5 = scmp.ne.s32.totalorder %s42_s9, %s1997_s10  ;;  %p2003_p7 = scmp.lt.s32.totalorder %s1997_s10, %s1997_s10 }
  0x12   :  { %p2004_p8 = por %p2003_p7, %p2002_p6 }
  0x14   :  { %p2005_p9 = pnand %p2004_p8, %p1998_p5 }
  0x16   :  { %2008 = shalt.err (!%p2005_p9)
}
  0x17   :  { %s2017_s11 = smov 512   ;;  %s2018_s12 = smov 32  }
  0x18   :  { %47 = dma.hbm_to_vmem [thread:$0]  %s2306_s6, 4608, %s42_s9, [#allocation5], %s2017_s11, %s2017_s11, %s2018_s12  }
  0x19   :  { %2009 = dma.done.wait [#allocation3], 3072  }
  0x1a   :  { %2010 = vsyncadd [#allocation3], 4294964224 }
  0x1b   :  { %2011 = dma.done.wait [#allocation5], 4608  }
  0x1c   :  { %2012 = vsyncadd [#allocation5], 4294962688  ;;  %v2019_v0 = vmov 0.0   ;;  %vm2020_vm0 = vmmov 0   ;;  %vm86_vm1 = vcmask 1045504   ;;  %vm76_vm2 = vcmask 48128  }
  0x1d   :  { %1812 = vmatprep.subr.mxu0 %v2019_v0  ;;  %1814 = vmatprep.mubr.msk.f32.mxu0 %vm2020_vm0, %v2019_v0  ;;  %v65_v1 = vld [vmem:[#allocation2] sm:$0x3f]  ;;  %v70_v3 = vld [vmem:[#allocation2 + $0x28] sm:$0xff]  ;;  %v2106_v5 = vld [vmem:[%s2301_s1 + $0x10] sm:$0xff]  ;;  %vm177_vm3 = vcmask 261120   ;;  %vm277_vm4 = vcmask 1043456  }
  0x1e   :  { %1936 = vmatprep.subr.mxu1 %v2019_v0  ;;  %1834 = vmatprep.mubr.msk.f32.mxu1 %vm2020_vm0, %v2019_v0  ;;  %v2084_v2 = vld [vmem:[%s2301_s1] sm:$0xff]  ;;  %v2095_v4 = vld [vmem:[%s2301_s1 + $0x8] sm:$0xff]  ;;  %v68_v7 = vld [vmem:[#allocation2 + $0x18] sm:$0xff]  ;;  %vm267_vm5 = vcmask 97280   ;;  %v2021_v27 = vmov 1   ;;  %v2022_v36 = vmov 2  }
  0x1f   :  { %1813 = vmatpush3.msk.msra.mxu0 %vm86_vm1, %v65_v1  ;;  %1940 = vmatpush3.msra.mxu1 %v70_v3  ;;  %v69_v6 = vld [vmem:[#allocation2 + $0x20] sm:$0xff]  ;;  %v67_v8 = vld [vmem:[#allocation2 + $0x10] sm:$0xff]  ;;  %v1706_v9 = vld [vmem:[#allocation2 + $0x8] ss:$0 sm:$0xff]  ;;  %v2023_v41 = vmov 3   ;;  %v2024_v42 = vmov 0  }
  0x20   :  { %1815 = vmatmul.mubr.msk.f32.vlgmr.msra.gmra.mxu0 %vm76_vm2, %v2084_v2  ;;  %1823 = vmatprep.subr.mxu0 %v2019_v0  ;;  %v2120_v14 = vld [vmem:[%s2300_s0 + $0x8] sm:$0xf]  ;;  %v2126_v16 = vld [vmem:[%s2300_s0] sm:$0xff]  ;;  %v2160_v26 = vld [vmem:[%s2302_s2 + $0x10] sm:$0xff]  ;;  %s2026_s27 = smov 64   ;;  %vm469_vm6 = vcmask 195584  }
  0x21   :  { %1817 = vmatprep.mubr.msk.f32.mxu0 %vm2020_vm0, %v2019_v0  ;;  %1824 = vmatpush3.msra.mxu0 %v70_v3  ;;  %v2135_v18 = vld [vmem:[%s2302_s2] sm:$0xff]  ;;  %v2147_v23 = vld [vmem:[%s2302_s2 + $0x8] sm:$0xff]  ;;  %v1711_v43 = vld [vmem:[#allocation2 + $0x30] ss:$0 sm:$0xff]  ;;  %s2025_s2 = smov 96   ;;  %vm552_vm7 = vcmask 31744  }
  0x22   :  { %1825 = vmatprep.subr.mxu0 %v2019_v0  ;;  %1937 = vmatprep.subr.mxu1 %v2019_v0  ;;  %v645_v55 = vld [vmem:[#allocation2 + $0x48] sm:$0x3f]  ;;  %v2182_v60 = vld [vmem:[%s2303_s3] sm:$0xff]  ;;  %v662_v3 = vld [vmem:[#allocation4 + $0x78] sm:$0xff]  ;;  %vm1542_vm8 = vcmask 130048  }
  0x23   :  { %1826 = vmatpush3.msra.mxu0 %v69_v6  ;;  %1941 = vmatpush3.msra.mxu1 %v69_v6  ;;  %v658_v6 = vld [vmem:[#allocation4 + $0x58] sm:$0xff] }
  0x24   :  { %1818 = vmatmul.mubr.msk.f32.gmra.mxu0 %vm76_vm2, %v2095_v4  ;;  %1827 = vmatprep.subr.mxu0 %v2019_v0 }
  0x25   :  { %1820 = vmatprep.mubr.msk.f32.mxu0 %vm2020_vm0, %v2019_v0  ;;  %1938 = vmatprep.subr.mxu1 %v2019_v0 }
  0x26   :  { %1828 = vmatpush3.msra.mxu0 %v68_v7  ;;  %1942 = vmatpush3.msra.mxu1 %v68_v7 }
  0x27   :  { %1829 = vmatprep.subr.mxu0 %v2019_v0  ;;  %1939 = vmatprep.subr.mxu1 %v2019_v0 }
  0x28   :  { %1821 = vmatmul.mubr.msk.f32.gmra.mxu0 %vm76_vm2, %v2106_v5  ;;  %1943 = vmatpush3.msra.mxu1 %v67_v8 }
  0x29   :  { %1831 = vmatprep.mubr.msk.f32.mxu0 %vm2020_vm0, %v2019_v0  ;;  %1830 = vmatpush3.msra.mxu0 %v67_v8  ;;  %v657_v8 = vld [vmem:[#allocation4 + $0x50] sm:$0xff] }
  0x2a   :  { %1840 = vmatprep.subr.mxu0 %v2019_v0  ;;  %1959 = vset.pattern.permute.xlu1 %v2021_v27 }
  0x2b   :  { %1961 = vset.pattern.permute.xlu0 %v2021_v27 }
  0xe0   :  { %v156_v10 = vpop.f32.mrf.mxu0 }
  0xe1   :  { %v157_v11 = vadd.f32 %v1706_v9, %v156_v10  ;;  %v653_v10 = vld [vmem:[#allocation4 + $0x30] sm:$0xff] }
  0xe2   :  { %v1816_v12 = vpop.f32.mrf.mxu0 }
  0xe3   :  { %v170_v13 = vmax.f32 %v157_v11, 0.0 }
  0xe4   :  { %v161_v15 = vpop.f32.mrf.mxu0 }
  0xe5   :  { %1832 = vmatmul.mubr.msk.f32.vlgmr.msra.gmra.mxu0 %vm177_vm3, %v170_v13  ;;  %v162_v17 = vadd.f32 %v1706_v9, %v161_v15 }
  0xe6   :  { %1841 = vmatpush3.msk.msra.mxu0 %vm277_vm4, %v2120_v14  ;;  %1844 = vmatprep.mubr.msk.f32.mxu0 %vm2020_vm0, %v2019_v0  ;;  %v1819_v19 = vpop.f32.mrf.mxu0 }
  0xe7   :  { %1842 = vmatprep.subr.mxu0 %v2019_v0  ;;  %v171_v20 = vmax.f32 %v162_v17, 0.0 }
  0xe8   :  { %1843 = vmatpush3.msra.mxu0 %v2126_v16  ;;  %v166_v21 = vpop.f32.mrf.mxu0 }
  0xe9   :  { %1845 = vmatmul.mubr.msk.f32.vlgmr.msra.gmra.mxu0 %vm267_vm5, %v2135_v18  ;;  %1835 = vmatmul.mubr.msk.f32.vlgmr.msra.gmra.mxu1 %vm177_vm3, %v171_v20  ;;  %v167_v22 = vadd.f32 %v1706_v9, %v166_v21  ;;  %v654_v9 = vld [vmem:[#allocation4 + $0x38] sm:$0xff] }
  0xea   :  { %1847 = vmatprep.mubr.msk.f32.mxu0 %vm2020_vm0, %v2019_v0  ;;  %v1822_v24 = vpop.f32.mrf.mxu0  ;;  %1837 = vmatprep.mubr.msk.f32.mxu1 %vm2020_vm0, %v2019_v0 }
  0xeb   :  { %v172_v25 = vmax.f32 %v167_v22, 0.0  ;;  %1867 = vmatprep.subr.mxu0 %v2019_v0 }
  0xec   :  { %1868 = vmatpush3.msk.msra.mxu0 %vm86_vm1, %v645_v55 }
  0xed   :  { %1848 = vmatmul.mubr.msk.f32.gmra.mxu0 %vm267_vm5, %v2147_v23  ;;  %1838 = vmatmul.mubr.msk.f32.gmra.mxu1 %vm177_vm3, %v172_v25 }
  0xee   :  { %1850 = vmatprep.mubr.msk.f32.mxu0 %vm2020_vm0, %v2019_v0  ;;  %1859 = vmatprep.mubr.msk.f32.mxu1 %vm469_vm6, %v2182_v60 }
  0xef   :  { %892 = vmatprep.subr.mxu0 %v662_v3  ;;  %v1042_v3 = vld [vmem:[#allocation4 + $0xe0] sm:$0xff] }
  0xf1   :  { %1851 = vmatmul.mubr.msk.f32.gmra.mxu0 %vm267_vm5, %v2160_v26 }
  0xf2   :  { %1869 = vmatprep.mubr.msk.f32.mxu0 %vm2020_vm0, %v2019_v0 }
  0xf5   :  { %1870 = vmatmul.mubr.msk.f32.vlgmr.msra.gmra.mxu0 %vm76_vm2, %v2084_v2 }
  0xf6   :  { %1872 = vmatprep.mubr.msk.f32.mxu0 %vm2020_vm0, %v2019_v0 }
  0xf9   :  { %1873 = vmatmul.mubr.msk.f32.gmra.mxu0 %vm76_vm2, %v2095_v4  ;;  %v661_v4 = vld [vmem:[#allocation4 + $0x70] sm:$0xff] }
  0xfa   :  { %1875 = vmatprep.mubr.msk.f32.mxu0 %vm2020_vm0, %v2019_v0  ;;  %893 = vmatpush1.msra.mxu0 %v661_v4  ;;  %v1039_v4 = vld [vmem:[#allocation4 + $0xc8] sm:$0xff] }
  0xfb   :  { %894 = vmatprep.subr.mxu0 %v658_v6  ;;  %v1038_v6 = vld [vmem:[#allocation4 + $0xc0] sm:$0xff] }
  0xfc   :  { %895 = vmatpush1.msra.mxu0 %v657_v8 }
  0xfd   :  { %1876 = vmatmul.mubr.msk.f32.gmra.mxu0 %vm76_vm2, %v2106_v5  ;;  %896 = vmatprep.subr.mxu0 %v654_v9 }
  0xfe   :  { %932 = vmatprep.mubr.f32.mxu0 %v2019_v0  ;;  %897 = vmatpush1.msra.mxu0 %v653_v10 }
 0x1a5   :  { %v253_v28 = vpop.f32.mrf.mxu0 }
 0x1a6   :  { %v2166_v44 = vadd.f32 %v1711_v43, %v253_v28 }
 0x1a7   :  { %v1833_v29 = vpop.f32.mrf.mxu0 }
 0x1a9   :  { %v347_v30 = vpop.f32.mrf.mxu0  ;;  %v258_v31 = vpop.f32.mrf.mxu1 }
 0x1aa   :  { %380 = vperm.xlu1 %1959, %v347_v30   ;;  %v259_v47 = vadd.f32 %v1711_v43, %v258_v31 }
 0x1ab   :  { %v1846_v32 = vpop.f32.mrf.mxu0  ;;  %v1836_v33 = vpop.f32.mrf.mxu1 }
 0x1ad   :  { %v352_v34 = vpop.f32.mrf.mxu0  ;;  %v263_v35 = vpop.f32.mrf.mxu1 }
 0x1ae   :  { %1960 = vset.pattern.permute.xlu1 %v2022_v36  ;;  %384 = vperm.xlu0 %1961, %v352_v34   ;;  %v264_v54 = vadd.f32 %v1711_v43, %v263_v35  ;;  %v656_v43 = vld [vmem:[#allocation4 + $0x48] sm:$0xff] }
 0x1af   :  { %410 = vperm.xlu1 %1960, %v347_v30   ;;  %v1849_v37 = vpop.f32.mrf.mxu0  ;;  %v1839_v38 = vpop.f32.mrf.mxu1 }
 0x1b1   :  { %v357_v39 = vpop.f32.mrf.mxu0 }
 0x1b2   :  { %1962 = vset.pattern.permute.xlu0 %v2022_v36 }
 0x1b3   :  { %414 = vperm.xlu0 %1962, %v352_v34   ;;  %418 = vperm.xlu1 %1960, %v357_v39   ;;  %v1852_v40 = vpop.f32.mrf.mxu0 }
 0x1b4   :  { %v551_v40 = vld [vmem:[#allocation2 + $0x38] sm:$0xf] }
 0x1b7   :  { %1963 = vset.pattern.permute.xlu0 %v2021_v27  ;;  %1965 = vset.pattern.permute.xlu1 %v2023_v41 }
 0x1b8   :  { %448 = vperm.xlu1 %1965, %v357_v39   ;;  %388 = vperm.xlu0 %1963, %v357_v39  }
 0x1bc   :  { %440 = vperm.xlu1 %1965, %v347_v30   ;;  %1964 = vset.pattern.permute.xlu0 %v2023_v41 }
 0x1bd   :  { %444 = vperm.xlu0 %1964, %v352_v34  }
 0x1c0   :  { %1967 = vset.pattern.permute.xlu1 %v2024_v42 }
 0x1c1   :  { %363 = vperm.xlu1 %1967, %v347_v30   ;;  %1966 = vset.pattern.permute.xlu0 %v2024_v42  ;;  %v659_v42 = vld [vmem:[#allocation4 + $0x60] sm:$0xff] }
 0x1c2   :  { %368 = vperm.xlu0 %1966, %v352_v34  }
 0x1c5   :  { %373 = vperm.xlu1 %1967, %v357_v39   ;;  %v2203_v39 = vld [vmem:[%s2303_s3 + $0x8] sm:$0xf]  ;;  %s2027_s3 = smov 112  }
 0x1c6   :  { %1968 = vset.pattern.permute.xlu0 %v2023_v41  ;;  %v660_v41 = vld [vmem:[#allocation4 + $0x68] sm:$0xff] }
 0x225   :  { %v381_v45 = vpop.permute.xlu1 %380 }
 0x226   :  { %v391_v46 = vmul.f32 %v381_v45, %v2166_v44  ;;  %v652_v45 = vld [vmem:[#allocation4 + $0x28] sm:$0xff] }
 0x228   :  { %397 = vrot.lane.b32.xlu0 %v391_v46, %s2025_s2  ;;  %v651_v46 = vld [vmem:[#allocation4 + $0x20] sm:$0xff] }
 0x229   :  { %v385_v48 = vpop.permute.xlu0 %384 }
 0x22a   :  { %v392_v49 = vmul.f32 %v385_v48, %v259_v47  ;;  %v411_v50 = vpop.permute.xlu1 %410  ;;  %v738_v48 = vpop.f32.mrf.mxu0 }
 0x22b   :  { %v421_v1 = vmul.f32 %v411_v50, %v2166_v44 }
 0x22c   :  { %399 = vrot.lane.b32.xlu0 %v392_v49, %s2025_s2  ;;  %v1871_v50 = vpop.f32.mrf.mxu0 }
 0x22e   :  { %v415_v51 = vpop.permute.xlu0 %414  ;;  %v419_v52 = vpop.permute.xlu1 %418 }
 0x22f   :  { %v422_v53 = vmul.f32 %v415_v51, %v259_v47  ;;  %v423_v61 = vmul.f32 %v419_v52, %v264_v54  ;;  %v650_v51 = vld [vmem:[#allocation4 + $0x18] sm:$0xff] }
 0x230   :  { %898 = vmatprep.subr.mxu0 %v650_v51 }
 0x231   :  { %429 = vrot.lane.b32.xlu1 %v422_v53, %s2026_s27  ;;  %v649_v53 = vld [vmem:[#allocation4 + $0x10] sm:$0xff] }
 0x232   :  { %899 = vmatpush1.msra.mxu0 %v649_v53 }
 0x233   :  { %v449_v56 = vpop.permute.xlu1 %448  ;;  %v389_v57 = vpop.permute.xlu0 %388 }
 0x234   :  { %v453_v58 = vmul.f32 %v449_v56, %v264_v54  ;;  %v393_v59 = vmul.f32 %v389_v57, %v264_v54 }
 0x236   :  { %461 = vrot.lane.b32.xlu0 %v453_v58, %s2018_s12  ;;  %401 = vrot.lane.b32.xlu1 %v393_v59, %s2025_s2 }
 0x237   :  { %v441_v2 = vpop.permute.xlu1 %440 }
 0x238   :  { %v445_v62 = vpop.permute.xlu0 %444  ;;  %v451_v7 = vmul.f32 %v441_v2, %v2166_v44  ;;  %v1043_v2 = vld [vmem:[#allocation4 + $0xe8] sm:$0xff] }
 0x239   :  { %v452_v63 = vmul.f32 %v445_v62, %v259_v47 }
 0x23a   :  { %431 = vrot.lane.b32.xlu1 %v423_v61, %s2026_s27 }
 0x23b   :  { %459 = vrot.lane.b32.xlu0 %v452_v63, %s2018_s12  ;;  %v1047_v63 = vld [vmem:[#allocation4 + $0x108] sm:$0xff] }
 0x23c   :  { %v364_v5 = vpop.permute.xlu1 %363  ;;  %1083 = vmatprep.subr.mxu0 %v1047_v63 }
 0x23d   :  { %v369_v11 = vpop.permute.xlu0 %368  ;;  %v376_v30 = vmul.f32 %v364_v5, %v2166_v44  ;;  %v655_v44 = vld [vmem:[#allocation4 + $0x40] sm:$0xff] }
 0x23e   :  { %427 = vrot.lane.b32.xlu1 %v421_v1, %s2026_s27  ;;  %v377_v22 = vmul.f32 %v369_v11, %v259_v47  ;;  %v1725_v47 = vld [vmem:[#allocation2 + $0x50] ss:$0 sm:$0xff]  ;;  %v1046_v1 = vld [vmem:[#allocation4 + $0x100] sm:$0xff] }
 0x23f   :  { %v739_v49 = vadd.f32 %v1725_v47, %v738_v48  ;;  %v1724_v5 = vld [vmem:[#allocation2 + $0x40] ss:$0 sm:$0xff]  ;;  %v756_v48 = vlaneseq }
 0x240   :  { %v374_v13 = vpop.permute.xlu1 %373 }
 0x241   :  { %v378_v21 = vmul.f32 %v374_v13, %v264_v54  ;;  %v752_v52 = vmax.f32 %v739_v49, 0.0  ;;  %v743_v54 = vpop.f32.mrf.mxu0  ;;  %v757_v50 = vshrl.u32 %v756_v48, 7 }
 0x242   :  { %457 = vrot.lane.b32.xlu1 %v451_v7, %s2018_s12  ;;  %v744_v55 = vadd.f32 %v1725_v47, %v743_v54  ;;  %v1035_v7 = vld [vmem:[#allocation4 + $0xa8] sm:$0xff] }
 0x243   :  { %1733 = vmatmul.mubr.msk.f32.vlgmr.msra.gmra.mxu0 %vm177_vm3, %v752_v52  ;;  %v1874_v56 = vpop.f32.mrf.mxu0  ;;  %v758_v51 = vsub.s32 0, %v757_v50  ;;  %v770_v53 = vsub.s32 3, %v757_v50 }
 0x244   :  { %938 = vmatprep.mubr.f32.mxu0 %v2019_v0  ;;  %v753_v57 = vmax.f32 %v744_v55, 0.0  ;;  %1084 = vmatpush1.msra.mxu0 %v1046_v1 }
 0x245   :  { %v748_v58 = vpop.f32.mrf.mxu0  ;;  %1085 = vmatprep.subr.mxu0 %v1043_v2 }
 0x246   :  { %v749_v59 = vadd.f32 %v1725_v47, %v748_v58  ;;  %1086 = vmatpush1.msra.mxu0 %v1042_v3 }
 0x247   :  { %1734 = vmatmul.mubr.msk.f32.gmra.mxu0 %vm177_vm3, %v753_v57  ;;  %v1877_v61 = vpop.f32.mrf.mxu0  ;;  %1087 = vmatprep.subr.mxu0 %v1039_v4 }
 0x248   :  { %944 = vmatprep.mubr.f32.mxu0 %v2019_v0  ;;  %v754_v62 = vmax.f32 %v749_v59, 0.0  ;;  %1088 = vmatpush1.msra.mxu0 %v1038_v6 }
 0x249   :  { %1089 = vmatprep.subr.mxu0 %v1035_v7 }
 0x24b   :  { %1735 = vmatmul.mubr.msk.f32.gmra.mxu0 %vm177_vm3, %v754_v62 }
 0x24c   :  { %1123 = vmatprep.mubr.f32.mxu0 %v2019_v0 }
 0x29a   :  { %v398_v12 = vpop.permute.xlu0 %397 }
 0x29b   :  { %v406_v34 = vadd.f32 %v398_v12, %v376_v30  ;;  %v1036_v30 = vld [vmem:[#allocation4 + $0xb0] sm:$0xff] }
 0x29e   :  { %v400_v17 = vpop.permute.xlu0 %399 }
 0x29f   :  { %v407_v27 = vadd.f32 %v400_v17, %v377_v22  ;;  %v1048_v22 = vld [vmem:[#allocation4 + $0x110] sm:$0xff] }
 0x2a3   :  { %v430_v15 = vpop.permute.xlu1 %429 }
 0x2a4   :  { %v437_v31 = vadd.f32 %v430_v15, %v407_v27  ;;  %v1041_v27 = vld [vmem:[#allocation4 + $0xd8] sm:$0xff] }
 0x2a8   :  { %v402_v19 = vpop.permute.xlu1 %401  ;;  %v462_v20 = vpop.permute.xlu0 %461 }
 0x2a9   :  { %v408_v24 = vadd.f32 %v402_v19, %v378_v21  ;;  %v1049_v21 = vld [vmem:[#allocation4 + $0x118] sm:$0xff] }
 0x2ac   :  { %v432_v25 = vpop.permute.xlu1 %431 }
 0x2ad   :  { %v438_v28 = vadd.f32 %v432_v25, %v408_v24  ;;  %v460_v29 = vpop.permute.xlu0 %459  ;;  %v1045_v24 = vld [vmem:[#allocation4 + $0xf8] sm:$0xff]  ;;  %v1044_v25 = vld [vmem:[#allocation4 + $0xf0] sm:$0xff] }
 0x2ae   :  { %v467_v35 = vadd.f32 %v460_v29, %v437_v31  ;;  %v1037_v29 = vld [vmem:[#allocation4 + $0xb8] sm:$0xff]  ;;  %v1369_v31 = vld [vmem:[#allocation2 + $0x70] sm:$0xff] }
 0x2af   :  { %v468_v32 = vadd.f32 %v462_v20, %v438_v28  ;;  %v1040_v28 = vld [vmem:[#allocation4 + $0xd0] sm:$0xff] }
 0x2b0   :  { %v428_v33 = vpop.permute.xlu1 %427 }
 0x2b1   :  { %1853 = vmatprep.subr.mxu1 %v468_v32  ;;  %v436_v36 = vadd.f32 %v428_v33, %v406_v34 }
 0x2b2   :  { %1854 = vmatpush3.msra.mxu1 %v468_v32 }
 0x2b3   :  { %1855 = vmatprep.subr.mxu1 %v467_v35 }
 0x2b4   :  { %v458_v37 = vpop.permute.xlu1 %457  ;;  %1856 = vmatpush3.msra.mxu1 %v467_v35 }
 0x2b5   :  { %v466_v38 = vadd.f32 %v458_v37, %v436_v36 }
 0x2b7   :  { %1857 = vmatprep.subr.mxu1 %v466_v38 }
 0x2b8   :  { %1858 = vmatpush3.msra.mxu1 %v466_v38 }
 0x2b9   :  { %1860 = vmatmul.mubr.msk.f32.vlgmr.msra.gmra.mxu1 %vm469_vm6, %v2203_v39  ;;  %1862 = vmatprep.subr.msk.mxu1 %vm277_vm4, %v551_v40 }
 0x2ba   :  { %1863 = vmatpush3.msk.msra.mxu1 %vm277_vm4, %v551_v40  ;;  %1864 = vmatprep.mubr.msk.f32.mxu1 %vm552_vm7, %v2126_v16  ;;  %v648_v16 = vld [vmem:[#allocation4 + $0x8] sm:$0xff] }
 0x2bb   :  { %809 = vmatprep.subr.mxu1 %v660_v41  ;;  %v1367_v41 = vld [vmem:[#allocation2 + $0x60] sm:$0xff] }
 0x2bd   :  { %1865 = vmatmul.mubr.msk.f32.vlgmr.msra.gmra.mxu1 %vm552_vm7, %v2120_v14  ;;  %v647_v14 = vld [vmem:[#allocation4] sm:$0xff] }
 0x2be   :  { %810 = vmatpush1.msra.mxu1 %v659_v42  ;;  %849 = vmatprep.mubr.f32.mxu1 %v2019_v0 }
 0x2bf   :  { %811 = vmatprep.subr.mxu1 %v656_v43 }
 0x2c0   :  { %812 = vmatpush1.msra.mxu1 %v655_v44  ;;  %v1366_v44 = vld [vmem:[#allocation2 + $0x58] sm:$0xff] }
 0x2c1   :  { %813 = vmatprep.subr.mxu1 %v652_v45 }
 0x2c2   :  { %814 = vmatpush1.msra.mxu1 %v651_v46 }
 0x2c3   :  { %815 = vmatprep.subr.mxu1 %v648_v16 }
 0x2c4   :  { %816 = vmatpush1.msra.mxu1 %v647_v14  ;;  %v664_v14 = vld [vmem:[#allocation4 + $0x80] ss:$8 sm:$0xf] }
 0x2c5   :  { %1730 = vmatmul.mubr.msk.f32.vlgmr.msra.gmra.mxu1 %vm177_vm3, %v752_v52  ;;  %1878 = vmatprep.subr.mxu1 %v2019_v0  ;;  %v766_v52 = vsub.s32 2, %v757_v50  ;;  %v759_v55 = vrot.slane %v664_v14, %v758_v51  ;;  %v771_v58 = vrot.slane %v664_v14, %v770_v53 }
 0x2c6   :  { %855 = vmatprep.mubr.f32.mxu1 %v2019_v0 }
 0x2c7   :  { %v767_v56 = vrot.slane %v664_v14, %v766_v52 }
 0x2c9   :  { %1731 = vmatmul.mubr.msk.f32.gmra.mxu1 %vm177_vm3, %v753_v57 }
 0x2ca   :  { %861 = vmatprep.mubr.f32.mxu1 %v2019_v0 }
 0x2cd   :  { %1732 = vmatmul.mubr.msk.f32.gmra.mxu1 %vm177_vm3, %v754_v62 }
 0x2ce   :  { %1882 = vmatprep.mubr.msk.f32.mxu1 %vm2020_vm0, %v2019_v0 }
 0x303   :  { %v934_v46 = vpop.f32.mrf.mxu0 }
 0x304   :  { %v935_v62 = vadd.f32 %v934_v46, %v767_v56 }
 0x305   :  { %v936_v47 = vpop.f32.mrf.mxu0 }
 0x306   :  { %v937_v3 = vadd.f32 %v936_v47, %v771_v58 }
 0x307   :  { %v940_v49 = vpop.f32.mrf.mxu0 }
 0x309   :  { %v942_v16 = vpop.f32.mrf.mxu0 }
 0x30b   :  { %v946_v54 = vpop.f32.mrf.mxu0 }
 0x30d   :  { %v948_v59 = vpop.f32.mrf.mxu0 }
 0x379   :  { %v1861_v8 = vpop.f32.mrf.mxu1 }
 0x37b   :  { %v542_v9 = vpop.f32.mrf.mxu1 }
 0x37d   :  { %v1866_v10 = vpop.f32.mrf.mxu1 }
 0x37e   :  { %v633_v11 = vadd.f32 %v1866_v10, %v1861_v8  ;;  %v941_v10 = vadd.f32 %v940_v49, %v767_v56 }
 0x37f   :  { %v627_v12 = vpop.f32.mrf.mxu1 }
 0x380   :  { %v2226_v13 = vadd.f32 %v1724_v5, %v633_v11  ;;  %v628_v15 = vadd.f32 %v627_v12, %v542_v9 }
 0x382   :  { %v644_v17 = vmax.f32 %v2226_v13, 0.0  ;;  %v641_v19 = vadd.f32 %v1724_v5, %v628_v15  ;;  %v943_v13 = vadd.f32 %v942_v16, %v771_v58 }
 0x384   :  { %v643_v20 = vmax.f32 %v641_v19, 0.0  ;;  %1879 = vmatpush3.msk.msra.mxu1 %vm277_vm4, %v644_v17 }
 0x385   :  { %1880 = vmatprep.subr.mxu1 %v2019_v0  ;;  %v851_v32 = vpop.f32.mrf.mxu1 }
 0x386   :  { %1881 = vmatpush3.msra.mxu1 %v643_v20  ;;  %v852_v61 = vadd.f32 %v851_v32, %v759_v55  ;;  %v949_v32 = vadd.f32 %v948_v59, %v771_v58 }
 0x387   :  { %1883 = vmatmul.mubr.msk.f32.vlgmr.msra.gmra.mxu1 %vm267_vm5, %v2135_v18  ;;  %1166 = vmatprep.subr.mxu1 %v1049_v21  ;;  %v1034_v18 = vld [vmem:[#allocation4 + $0xa0] sm:$0xff]  ;;  %v853_v33 = vpop.f32.mrf.mxu1 }
 0x388   :  { %1885 = vmatprep.mubr.msk.f32.mxu1 %vm2020_vm0, %v2019_v0  ;;  %1167 = vmatpush1.msra.mxu1 %v1048_v22 }
 0x389   :  { %1168 = vmatprep.subr.mxu1 %v1045_v24  ;;  %1090 = vmatpush1.msra.mxu0 %v1034_v18 }
 0x38a   :  { %1169 = vmatpush1.msra.mxu1 %v1044_v25 }
 0x38b   :  { %1886 = vmatmul.mubr.msk.f32.gmra.mxu1 %vm267_vm5, %v2147_v23  ;;  %1170 = vmatprep.subr.mxu1 %v1041_v27  ;;  %v857_v23 = vpop.f32.mrf.mxu1 }
 0x38c   :  { %1888 = vmatprep.mubr.msk.f32.mxu1 %vm2020_vm0, %v2019_v0  ;;  %1171 = vmatpush1.msra.mxu1 %v1040_v28  ;;  %v858_v9 = vadd.f32 %v857_v23, %v759_v55  ;;  %v947_v28 = vadd.f32 %v946_v54, %v767_v56 }
 0x38d   :  { %1172 = vmatprep.subr.mxu1 %v1037_v29  ;;  %v2244_v34 = vpop.f32.mrf.mxu1 }
 0x38e   :  { %1173 = vmatpush1.msra.mxu1 %v1036_v30 }
 0x38f   :  { %1889 = vmatmul.mubr.msk.f32.gmra.mxu1 %vm267_vm5, %v2160_v26  ;;  %1900 = vmatprep.subr.mxu1 %v1369_v31  ;;  %v2246_v35 = vpop.f32.mrf.mxu1  ;;  %v1368_v26 = vld [vmem:[#allocation2 + $0x68] sm:$0xff] }
 0x390   :  { %1206 = vmatprep.mubr.f32.mxu1 %v2019_v0  ;;  %v864_v24 = vadd.f32 %v2246_v35, %v759_v55 }
 0x391   :  { %v2248_v36 = vpop.f32.mrf.mxu1 }
 0x447   :  { %v1020_v37 = vpop.f32.mrf.mxu1 }
 0x448   :  { %1740 = vmatmul.mubr.msk.f32.vlgmr.msra.gmra.mxu0 %vm177_vm3, %v1020_v37  ;;  %1743 = vmatmul.mubr.msk.f32.vlgmr.msra.gmra.mxu1 %vm177_vm3, %v1020_v37 }
 0x449   :  { %v1884_v38 = vpop.f32.mrf.mxu1  ;;  %1129 = vmatprep.mubr.f32.mxu0 %v2019_v0  ;;  %1212 = vmatprep.mubr.f32.mxu1 %v2019_v0 }
 0x44a   :  { %1901 = vmatpush3.msra.mxu1 %v1369_v31 }
 0x44b   :  { %v1025_v40 = vpop.f32.mrf.mxu1  ;;  %1902 = vmatprep.subr.mxu1 %v1368_v26 }
 0x44c   :  { %1741 = vmatmul.mubr.msk.f32.gmra.mxu0 %vm177_vm3, %v1025_v40  ;;  %1744 = vmatmul.mubr.msk.f32.gmra.mxu1 %vm177_vm3, %v1025_v40 }
 0x44d   :  { %v1887_v42 = vpop.f32.mrf.mxu1  ;;  %1135 = vmatprep.mubr.f32.mxu0 %v2019_v0  ;;  %1218 = vmatprep.mubr.f32.mxu1 %v2019_v0 }
 0x44e   :  { %1903 = vmatpush3.msra.mxu1 %v1368_v26 }
 0x44f   :  { %v1030_v43 = vpop.f32.mrf.mxu1  ;;  %1904 = vmatprep.subr.mxu1 %v1367_v41 }
 0x450   :  { %1742 = vmatmul.mubr.msk.f32.gmra.mxu0 %vm177_vm3, %v1030_v43  ;;  %1745 = vmatmul.mubr.msk.f32.gmra.mxu1 %vm177_vm3, %v1030_v43 }
 0x451   :  { %v1890_v45 = vpop.f32.mrf.mxu1  ;;  %1905 = vmatpush3.msra.mxu1 %v1367_v41  ;;  %1908 = vmatprep.mubr.msk.f32.mxu1 %vm177_vm3, %v643_v20 }
 0x452   :  { %1906 = vmatprep.subr.mxu1 %v1366_v44  ;;  %1897 = vmatprep.mubr.msk.f32.mxu0 %vm469_vm6, %v2182_v60  ;;  %v762_v60 = vsub.s32 1, %v757_v50 }
 0x453   :  { %1907 = vmatpush3.msra.mxu1 %v1366_v44 }
 0x454   :  { %1909 = vmatmul.mubr.msk.f32.vlgmr.msra.gmra.mxu1 %vm177_vm3, %v644_v17  ;;  %1925 = vmatprep.subr.mxu1 %v2019_v0  ;;  %v763_v57 = vrot.slane %v664_v14, %v762_v60 }
 0x455   :  { %1933 = vmatprep.mubr.msk.f32.mxu1 %vm2020_vm0, %v2019_v0 }
 0x456   :  { %v854_v2 = vadd.f32 %v853_v33, %v763_v57  ;;  %v860_v12 = vadd.f32 %v2244_v34, %v763_v57  ;;  %v866_v31 = vadd.f32 %v2248_v36, %v763_v57 }
 0x508   :  { %v1125_v63 = vpop.f32.mrf.mxu0  ;;  %v1208_v1 = vpop.f32.mrf.mxu1 }
 0x509   :  { %v1225_v4 = vmul.f32 %v1125_v63, %v852_v61  ;;  %v1227_v6 = vmul.f32 %v1208_v1, %v935_v62  ;;  %v1750_v1 = vld [vmem:[#allocation2 + $0x78] ss:$0 sm:$0xff] }
 0x50a   :  { %v1127_v7 = vpop.f32.mrf.mxu0  ;;  %v1210_v8 = vpop.f32.mrf.mxu1 }
 0x50b   :  { %v1226_v5 = vmul.f32 %v1127_v7, %v854_v2  ;;  %v1228_v11 = vmul.f32 %v1210_v8, %v937_v3  ;;  %v1237_v19 = vadd.f32 %v1227_v6, %v1225_v4 }
 0x50c   :  { %v1131_v15 = vpop.f32.mrf.mxu0  ;;  %v1214_v17 = vpop.f32.mrf.mxu1 }
 0x50d   :  { %v1238_v20 = vadd.f32 %v1228_v11, %v1226_v5  ;;  %v1229_v21 = vmul.f32 %v1131_v15, %v858_v9  ;;  %v1231_v22 = vmul.f32 %v1214_v17, %v941_v10  ;;  %v1536_v5 = vld [vmem:[#allocation2 + $0x88] sm:$0xff]  ;;  %v1535_v11 = vld [vmem:[#allocation2 + $0x80] sm:$0xff] }
 0x50e   :  { %v1133_v25 = vpop.f32.mrf.mxu0  ;;  %v1216_v27 = vpop.f32.mrf.mxu1  ;;  %v1619_v17 = vld [vmem:[#allocation2 + $0xa8] sm:$0xff] }
 0x50f   :  { %v1230_v29 = vmul.f32 %v1133_v25, %v860_v12  ;;  %v1232_v18 = vmul.f32 %v1216_v27, %v943_v13  ;;  %v1243_v30 = vadd.f32 %v1238_v20, %v1237_v19  ;;  %v1239_v34 = vadd.f32 %v1231_v22, %v1229_v21  ;;  %v1620_v12 = vld [vmem:[#allocation2 + $0xb0] sm:$0xff]  ;;  %v1618_v19 = vld [vmem:[#allocation2 + $0xa0] sm:$0xff]  ;;  %v1617_v20 = vld [vmem:[#allocation2 + $0x98] sm:$0xff] }
 0x510   :  { %v1137_v33 = vpop.f32.mrf.mxu0  ;;  %v1220_v23 = vpop.f32.mrf.mxu1  ;;  %1926 = vmatpush3.msra.mxu1 %v1620_v12  ;;  %v1753_v21 = vld [vmem:[#allocation2 + $0x90] ss:$0 sm:$0xff] }
 0x511   :  { %v1240_v37 = vadd.f32 %v1232_v18, %v1230_v29  ;;  %v1233_v26 = vmul.f32 %v1137_v33, %v864_v24  ;;  %v1235_v38 = vmul.f32 %v1220_v23, %v947_v28  ;;  %1927 = vmatprep.subr.mxu1 %v2019_v0  ;;  %v1755_v28 = vld [vmem:[#allocation2 + $0xb8] ss:$0 sm:$0xff] }
 0x512   :  { %v1139_v40 = vpop.f32.mrf.mxu0  ;;  %v1222_v41 = vpop.f32.mrf.mxu1  ;;  %1928 = vmatpush3.msra.mxu1 %v1619_v17 }
 0x513   :  { %v1234_v42 = vmul.f32 %v1139_v40, %v866_v31  ;;  %v1236_v43 = vmul.f32 %v1222_v41, %v949_v32  ;;  %v1244_v35 = vadd.f32 %v1240_v37, %v1239_v34  ;;  %v1241_v44 = vadd.f32 %v1235_v38, %v1233_v26  ;;  %1929 = vmatprep.subr.mxu1 %v2019_v0 }
 0x514   :  { %v1910_v62 = vpop.f32.mrf.mxu1  ;;  %1930 = vmatpush3.msra.mxu1 %v1618_v19 }
 0x515   :  { %v1242_v45 = vadd.f32 %v1236_v43, %v1234_v42  ;;  %1251 = vrot.lane.b32.xlu1 %v1244_v35, %s2026_s27  ;;  %1931 = vmatprep.subr.mxu1 %v2019_v0 }
 0x516   :  { %v1441_v3 = vpop.f32.mrf.mxu1  ;;  %1932 = vmatpush3.msra.mxu1 %v1617_v20 }
 0x517   :  { %v1245_v46 = vadd.f32 %v1242_v45, %v1241_v44 }
 0x519   :  { %1253 = vrot.lane.b32.xlu0 %v1245_v46, %s2026_s27 }
 0x51d   :  { %1249 = vrot.lane.b32.xlu0 %v1243_v30, %s2026_s27 }
 0x587   :  { %v1252_v36 = vpop.permute.xlu1 %1251 }
 0x588   :  { %v1259_v47 = vadd.f32 %v1252_v36, %v1244_v35 }
 0x58a   :  { %1266 = vrot.lane.b32.xlu0 %v1259_v47, %s2025_s2 }
 0x58b   :  { %v1254_v48 = vpop.permute.xlu0 %1253 }
 0x58c   :  { %v1260_v49 = vadd.f32 %v1254_v48, %v1245_v46 }
 0x58e   :  { %1268 = vrot.lane.b32.xlu1 %v1260_v49, %s2025_s2 }
 0x58f   :  { %v1250_v50 = vpop.permute.xlu0 %1249 }
 0x590   :  { %v1258_v16 = vadd.f32 %v1250_v50, %v1243_v30 }
 0x592   :  { %1264 = vrot.lane.b32.xlu1 %v1258_v16, %s2025_s2 }
 0x5fc   :  { %v1267_v51 = vpop.permute.xlu0 %1266 }
 0x5fd   :  { %v1274_v52 = vadd.f32 %v1267_v51, %v1259_v47 }
 0x5ff   :  { %1281 = vrot.lane.b32.xlu1 %v1274_v52, %s2027_s3 }
 0x600   :  { %v1269_v14 = vpop.permute.xlu1 %1268 }
 0x601   :  { %v1275_v60 = vadd.f32 %v1269_v14, %v1260_v49 }
 0x603   :  { %1283 = vrot.lane.b32.xlu0 %v1275_v60, %s2027_s3 }
 0x604   :  { %v1265_v53 = vpop.permute.xlu1 %1264 }
 0x605   :  { %v1273_v54 = vadd.f32 %v1265_v53, %v1258_v16 }
 0x607   :  { %1279 = vrot.lane.b32.xlu0 %v1273_v54, %s2027_s3 }
 0x671   :  { %v1282_v55 = vpop.permute.xlu1 %1281 }
 0x672   :  { %v1289_v58 = vadd.f32 %v1282_v55, %v1274_v52 }
 0x675   :  { %v1284_v56 = vpop.permute.xlu0 %1283 }
 0x676   :  { %v1290_v57 = vadd.f32 %v1284_v56, %v1275_v60 }
 0x678   :  { %1891 = vmatprep.subr.mxu0 %v1290_v57 }
 0x679   :  { %1892 = vmatpush3.msra.mxu0 %v1290_v57  ;;  %v1280_v59 = vpop.permute.xlu0 %1279 }
 0x67a   :  { %v1288_v61 = vadd.f32 %v1280_v59, %v1273_v54  ;;  %1893 = vmatprep.subr.mxu0 %v1289_v58 }
 0x67b   :  { %1894 = vmatpush3.msra.mxu0 %v1289_v58 }
 0x67c   :  { %1895 = vmatprep.subr.mxu0 %v1288_v61 }
 0x67d   :  { %1896 = vmatpush3.msra.mxu0 %v1288_v61 }
 0x67e   :  { %1898 = vmatmul.mubr.msk.f32.vlgmr.msra.gmra.mxu0 %vm469_vm6, %v2203_v39  ;;  %1911 = vmatprep.subr.mxu0 %v2019_v0  ;;  %v64_v39 = vld [vmem:[%s2304_s4] sm:$0x3] }
 0x67f   :  { %1915 = vmatprep.mubr.msk.f32.mxu0 %vm2020_vm0, %v2019_v0 }
 0x73e   :  { %v1899_v63 = vpop.f32.mrf.mxu0 }
 0x73f   :  { %v1447_v2 = vadd.f32 %v1910_v62, %v1899_v63 }
 0x740   :  { %v1357_v4 = vpop.f32.mrf.mxu0 }
 0x741   :  { %v1456_v6 = vadd.f32 %v1750_v1, %v1447_v2  ;;  %v1442_v7 = vadd.f32 %v1441_v3, %v1357_v4 }
 0x743   :  { %v1458_v8 = vmax.f32 %v1456_v6, 0.0  ;;  %v1455_v9 = vadd.f32 %v1750_v1, %v1442_v7 }
 0x745   :  { %v1457_v10 = vmax.f32 %v1455_v9, 0.0  ;;  %1912 = vmatpush3.msk.msra.mxu0 %vm277_vm4, %v1458_v8 }
 0x746   :  { %1913 = vmatprep.subr.mxu0 %v2019_v0 }
 0x747   :  { %1914 = vmatpush3.msra.mxu0 %v1457_v10 }
 0x748   :  { %1916 = vmatmul.mubr.msk.f32.vlgmr.msra.gmra.mxu0 %vm267_vm5, %v64_v39  ;;  %1918 = vmatprep.subr.mxu0 %v2019_v0 }
 0x749   :  { %1919 = vmatpush3.msra.mxu0 %v1536_v5  ;;  %1922 = vmatprep.mubr.msk.f32.mxu0 %vm2020_vm0, %v2019_v0 }
 0x74a   :  { %1920 = vmatprep.subr.mxu0 %v2019_v0 }
 0x74b   :  { %1921 = vmatpush3.msra.mxu0 %v1535_v11 }
 0x808   :  { %v1531_v13 = vpop.f32.mrf.mxu0 }
 0x809   :  { %1923 = vmatmul.mubr.msk.f32.vlgmr.msra.gmra.mxu0 %vm1542_vm8, %v1531_v13 }
 0x80a   :  { %v1917_v15 = vpop.f32.mrf.mxu0 }
 0x8c9   :  { %v1612_v22 = vpop.f32.mrf.mxu0 }
 0x8ca   :  { %v1613_v24 = vadd.f32 %v1753_v21, %v1612_v22 }
 0x8cb   :  { %v1924_v25 = vpop.f32.mrf.mxu0 }
 0x8cc   :  { %v1616_v27 = vmax.f32 %v1613_v24, 0.0 }
 0x8ce   :  { %1934 = vmatmul.mubr.msk.f32.vlgmr.msra.gmra.mxu1 %vm177_vm3, %v1616_v27 }
 0x98e   :  { %v1695_v29 = vpop.f32.mrf.mxu1 }
 0x98f   :  { %v1696_v18 = vadd.f32 %v1755_v28, %v1695_v29 }
 0x990   :  { %v1935_v30 = vpop.f32.mrf.mxu1 }
 0x991   :  { %1699 = vst [vmem:[%s2307_s7] sm:$0x3] %v1696_v18 }
 0x992   :  { %1704 = vsyncpa [#allocation3], 1 }
 0x993   :  { %1705 = vsyncpa [#allocation5], 1 }

</bundles_post_ra>
